<compile_context>
chip_gen: v6e
topology: v6e:2x2x1
jax: 0.10.0
libtpu: 0.0.40
codegen_flags: <defaults>
</compile_context>

<pallas_src>
import functools

import jax
import jax.numpy as jnp
from jax import lax
from jax.experimental import pallas as pl
from jax.experimental.pallas import tpu as pltpu

_LANE = 128
_SUBLANE = 8


def _row_align(*dtypes):
    """Second-to-minor row multiple required by the narrowest streamed dtype."""
    a = _SUBLANE
    for dt in dtypes:
        itemsize = jnp.dtype(dt).itemsize
        a = max(a, _SUBLANE * max(1, 4 // itemsize))   # 8 (f32) / 16 (bf16) / 32 (i8, bool)
    return a


def _default_num_splits():
    """2 on multi-TensorCore chips (v4/v5p/v7x megacore), else 1."""
    try:
        kind = jax.devices()[0].device_kind.lower()
    except Exception:
        return 1
    return 2 if any(tag in kind for tag in ("v4", "v5p", "v7")) else 1


def _focal_loss_kernel(x_ref, t_ref, o_ref, *, gamma, pos_weight,
                       binary_targets, rows_valid, tile_rows, num_steps):
    p = pl.program_id(0)          # parallel split (megacore / v7x)
    j = pl.program_id(1)          # sequential reduction axis

    # The (8,128) output block for this split stays resident across the whole
    # j loop -> it doubles as the accumulator (no scratch, no per-step XLU
    # cross-lane reduce).
    @pl.when(j == 0)
    def _init():
        o_ref[...] = jnp.zeros(o_ref.shape, o_ref.dtype)

    blk = p * num_steps + j       # logical block index along the row axis

    x = x_ref[...].astype(jnp.float32)
    t = t_ref[...].astype(jnp.float32)

    # Numerically stable BCE-with-logits with pos_weight (matches PyTorch):
    #   bce = (1 - t) * x + (1 + (pw - 1) * t) * softplus(-x)
    e = jnp.exp(-jnp.abs(x))                                   # EUP #1 (reused)
    softplus_neg_x = jnp.maximum(-x, 0.0) + jnp.log1p(e)       # EUP #2
    pw = float(pos_weight)
    if pw == 1.0:
        bce = (1.0 - t) * x + softplus_neg_x
    else:
        bce = (1.0 - t) * x + (1.0 + (pw - 1.0) * t) * softplus_neg_x

    if binary_targets and pw == 1.0:
        # For 0/1 targets and pos_weight == 1:
        #   pt = exp(-bce) = sigmoid(x) if t == 1 else sigmoid(-x).
        # Reuse e = exp(-|x|) instead of issuing a third EUP exp:
        #   sigmoid(|x|)  = 1 / (1 + e),   sigmoid(-|x|) = e / (1 + e)
        inv = 1.0 / (1.0 + e)                 # full-precision divide
        a = e * inv
        u = jnp.where(x >= 0.0, t, 1.0 - t)
        one_minus_pt = u * a + (1.0 - u) * inv     # == 1 - pt, already in [0,1]
    else:
        pt = jnp.exp(-bce)                          # EUP #3 (exact fallback)
        one_minus_pt = jnp.maximum(1.0 - pt, 0.0)   # clamp few-ULP negatives

    # Small integer gamma -> repeated multiply on the VPU; float pow would add
    # 2 extra EUP transcendentals per element.
    g_int = int(gamma)
    if float(g_int) == float(gamma) and 0 <= g_int <= 4:
        if g_int == 0:
            mod = jnp.ones_like(one_minus_pt)
        else:
            mod = one_minus_pt
            for _ in range(g_int - 1):
                mod = mod * one_minus_pt
    else:
        mod = one_minus_pt ** gamma

    # alpha is folded into the final scalar scale in the wrapper.
    focal = mod * bce

    # (tile_rows, 128) -> (8, 128) partial sum in two stages so the serial add
    # chain into a single accumulator stays short at large tiles.
    r = tile_rows // _SUBLANE
    k = 8
    while r % k:
        k //= 2

    def _reduce(v):
        s = jnp.sum(v.reshape(r // k, k * _SUBLANE, _LANE), axis=0)
        return jnp.sum(s.reshape(k, _SUBLANE, _LANE), axis=0)

    # Only the last real block (and clamped duplicate blocks of an uneven
    # split) overhangs the valid rows; interior tiles skip the iota/compare/
    # select entirely.  Row-based threshold -> no int32 overflow even for
    # multi-billion-element inputs.
    needs_mask = (blk + 1) * tile_rows > rows_valid

    @pl.when(jnp.logical_not(needs_mask))
    def _acc_interior():
        o_ref[...] += _reduce(focal)

    @pl.when(needs_mask)
    def _acc_boundary():
        rid = lax.broadcasted_iota(jnp.int32, focal.shape, 0)
        valid = blk * tile_rows + rid < rows_valid
        # Select does not propagate NaN/Inf from the unselected (stale /
        # duplicate) lanes, so no pre-masking of x / t is needed.
        o_ref[...] += _reduce(jnp.where(valid, focal, 0.0))


def focal_loss(inputs, targets, *, alpha=2.0, gamma=2.0, pos_weight=1.0,
               tile_rows=2048, num_splits=None, binary_targets=True,
               input_buffering=None):
    """Pallas-TPU focal loss (mean over all elements).

    inputs / targets: any matching shape; streamed in their native dtype
    (pass bf16 logits / int8-bool targets straight from the producer to cut
    HBM traffic).  binary_targets=True assumes 0/1 labels (standard focal
    loss) and saves one EUP exp per element; set False for soft labels.
    """
    assert inputs.shape == targets.shape
    if num_splits is None:
        num_splits = _default_num_splits()

    x = inputs.reshape(-1)          # metadata-only for contiguous inputs
    t = targets.reshape(-1)
    n = int(x.shape[0])

    row_align = _row_align(x.dtype, t.dtype)
    min_chunk = row_align * _LANE
    n_main = (n // min_chunk) * min_chunk

    # --- ragged tail (< one aligned chunk): plain JAX, no full-array pad -----
    tail_sum = jnp.float32(0.0)
    if n_main < n:
        xt = x[n_main:].astype(jnp.float32)
        tt = t[n_main:].astype(jnp.float32)
        sp = jnp.maximum(-xt, 0.0) + jnp.log1p(jnp.exp(-jnp.abs(xt)))
        bce_t = (1.0 - tt) * xt + (1.0 + (float(pos_weight) - 1.0) * tt) * sp
        tail_sum = jnp.sum((1.0 - jnp.exp(-bce_t)) ** gamma * bce_t)

    if n_main == 0:
        return tail_sum * (float(alpha) / n)

    # --- main body: Pallas kernel on the aligned prefix ----------------------
    x_main = x if n_main == n else x[:n_main]
    t_main = t if n_main == n else t[:n_main]

    rows = n_main // _LANE
    tr = min(int(tile_rows), rows)
    tr = max(row_align, (tr // row_align) * row_align)
    nblocks = pl.cdiv(rows, tr)
    splits = max(1, min(int(num_splits), nblocks))
    steps = pl.cdiv(nblocks, splits)

    xp = x_main.reshape(rows, _LANE)
    tp = t_main.reshape(rows, _LANE)

    kernel = functools.partial(
        _focal_loss_kernel,
        gamma=float(gamma), pos_weight=float(pos_weight),
        binary_targets=bool(binary_targets),
        rows_valid=rows, tile_rows=tr, num_steps=steps)

    if splits * steps > nblocks:
        # Uneven split: clamp the DMA index; the kernel masks the duplicate.
        def in_map(p, j):
            return (jnp.minimum(p * steps + j, nblocks - 1), 0)
    else:
        def in_map(p, j):
            return (p * steps + j, 0)

    spec_kwargs = {}
    if input_buffering is not None and int(input_buffering) != 2:
        spec_kwargs["pipeline_mode"] = pl.Buffered(int(input_buffering))
    in_spec = pl.BlockSpec((tr, _LANE), in_map, **spec_kwargs)

    # Raise the scoped-VMEM limit only when the buffered input blocks would
    # not fit the conservative per-generation default (v5e: 16 MiB).
    n_bufs = int(input_buffering) if input_buffering is not None else 2
    block_bytes = n_bufs * tr * _LANE * (jnp.dtype(x.dtype).itemsize
                                         + jnp.dtype(t.dtype).itemsize)
    cp_kwargs = dict(dimension_semantics=("parallel", "arbitrary"))
    if block_bytes > 12 * 1024 * 1024:
        cp_kwargs["vmem_limit_bytes"] = int(block_bytes + (8 << 20))

    partials = pl.pallas_call(
        kernel,
        out_shape=jax.ShapeDtypeStruct((splits, _SUBLANE, _LANE), jnp.float32),
        grid_spec=pltpu.PrefetchScalarGridSpec(
            num_scalar_prefetch=0,
            grid=(splits, steps),
            in_specs=[in_spec, in_spec],
            out_specs=pl.BlockSpec((None, _SUBLANE, _LANE),
                                   lambda p, j: (p, 0, 0)),
        ),
        compiler_params=pltpu.CompilerParams(**cp_kwargs),
    )(xp, tp)

    # Tiny final cross-lane reduction; alpha and the mean normalization are
    # folded into a single scalar multiply (no per-element alpha vmul).
    return (jnp.sum(partials) + tail_sum) * (float(alpha) / n)


def focal_loss_ref(inputs, targets, *, alpha=2.0, gamma=2.0, pos_weight=1.0):
    x = inputs.astype(jnp.float32)
    t = targets.astype(jnp.float32)
    softplus_neg_x = jnp.maximum(-x, 0.0) + jnp.log1p(jnp.exp(-jnp.abs(x)))
    bce = (1.0 - t) * x + (1.0 + (pos_weight - 1.0) * t) * softplus_neg_x
    pt = jnp.exp(-bce)
    focal = alpha * (1.0 - pt) ** gamma * bce
    return jnp.mean(focal)


if __name__ == "__main__":
    key = jax.random.PRNGKey(0)
    k1, k2, k3, k4 = jax.random.split(key, 4)

    # Small NCHW-like logits / binary targets (module's intended use).
    shape = (2, 4, 16, 16)
    logits = jax.random.normal(k1, shape, dtype=jnp.float32) * 2.0
    targets = (jax.random.uniform(k2, shape) > 0.5).astype(jnp.float32)

    # 1) default fast path (binary targets, pos_weight == 1)
    out = jax.block_until_ready(focal_loss(logits, targets))
    ref = focal_loss_ref(logits, targets)
    assert jnp.allclose(out, ref, rtol=1e-5, atol=1e-6), (out, ref)

    # 2) exact exp(-bce) path
    out2 = jax.block_until_ready(focal_loss(logits, targets,
                                            binary_targets=False))
    assert jnp.allclose(out2, ref, rtol=1e-5, atol=1e-6), (out2, ref)

    # 3) pos_weight != 1 (generic fallback)
    out3 = jax.block_until_ready(focal_loss(logits, targets, pos_weight=1.5))
    ref3 = focal_loss_ref(logits, targets, pos_weight=1.5)
    assert jnp.allclose(out3, ref3, rtol=1e-5, atol=1e-6), (out3, ref3)

    # 4) ragged length -> aligned-prefix kernel + plain-JAX tail (no full pad)
    shape_r = (2, 4, 17, 16)
    logits_r = jax.random.normal(k3, shape_r, dtype=jnp.float32) * 2.0
    targets_r = (jax.random.uniform(k4, shape_r) > 0.5).astype(jnp.float32)
    out4 = jax.block_until_ready(focal_loss(logits_r, targets_r))
    ref4 = focal_loss_ref(logits_r, targets_r)
    assert jnp.allclose(out4, ref4, rtol=1e-5, atol=1e-6), (out4, ref4)

    print("KERNEL_OK")
</pallas_src>

<mosaic_0001>
module attributes {stable_mosaic.version = 11 : i64} {
  func.func @_focal_loss_kernel(%arg0: i32, %arg1: i32, %arg2: memref<16x128xf32, #tpu.memory_space<vmem>>, %arg3: memref<16x128xf32, #tpu.memory_space<vmem>>, %arg4: memref<1x8x128xf32, #tpu.memory_space<vmem>>) attributes {dimension_semantics = [#tpu.dimension_semantics<parallel>, #tpu.dimension_semantics<arbitrary>], iteration_bounds = array<i64: 1, 1>, scalar_prefetch = 0 : i64, scratch_operands = 0 : i64, tpu.core_type = #tpu.core_type<tc>, window_params = [{transform_indices = @transform_0, window_bounds = array<i64: 16, 128>}, {transform_indices = @transform_1, window_bounds = array<i64: 16, 128>}, {transform_indices = @transform_2, window_bounds = array<i64: 1, 8, 128>}]} {
    %c0_i32 = arith.constant 0 : i32
    %0 = arith.cmpi eq, %arg1, %c0_i32 : i32
    %1 = arith.extui %0 : i1 to i32
    %c0_i32_0 = arith.constant 0 : i32
    %2 = arith.cmpi ne, %1, %c0_i32_0 : i32
    scf.if %2 {
      %cst_16 = arith.constant 0.000000e+00 : f32
      %46 = vector.broadcast %cst_16 : f32 to vector<8x128xf32>
      %c0_17 = arith.constant 0 : index
      %c0_18 = arith.constant 0 : index
      %c0_19 = arith.constant 0 : index
      %47 = vector.load %arg4[%c0_17, %c0_18, %c0_19] : memref<1x8x128xf32, #tpu.memory_space<vmem>>, vector<1x8x128xf32>
      %48 = vector.shape_cast %47 : vector<1x8x128xf32> to vector<8x128xf32>
      %49 = vector.shape_cast %46 : vector<8x128xf32> to vector<1x8x128xf32>
      tpu.vector_store %arg4[%c0_17, %c0_18, %c0_19], %49 {strides = array<i32>} : memref<1x8x128xf32, #tpu.memory_space<vmem>>, vector<1x8x128xf32>,
    } else {
    }
    %c1_i32 = arith.constant 1 : i32
    %3 = arith.muli %arg0, %c1_i32 : i32
    %4 = arith.addi %3, %arg1 : i32
    %c0 = arith.constant 0 : index
    %c0_1 = arith.constant 0 : index
    %5 = vector.load %arg2[%c0, %c0_1] : memref<16x128xf32, #tpu.memory_space<vmem>>, vector<16x128xf32>
    %c0_2 = arith.constant 0 : index
    %c0_3 = arith.constant 0 : index
    %6 = vector.load %arg3[%c0_2, %c0_3] : memref<16x128xf32, #tpu.memory_space<vmem>>, vector<16x128xf32>
    %7 = math.absf %5 : vector<16x128xf32>
    %cst = arith.constant 0.000000e+00 : f32
    %8 = vector.broadcast %cst : f32 to vector<16x128xf32>
    %9 = arith.subf %8, %7 : vector<16x128xf32>
    %10 = math.exp %9 : vector<16x128xf32>
    %cst_4 = arith.constant 0.000000e+00 : f32
    %11 = vector.broadcast %cst_4 : f32 to vector<16x128xf32>
    %12 = arith.subf %11, %5 : vector<16x128xf32>
    %cst_5 = arith.constant 0.000000e+00 : f32
    %13 = vector.broadcast %cst_5 : f32 to vector<16x128xf32>
    %14 = arith.maximumf %12, %13 : vector<16x128xf32>
    %15 = math.log1p %10 : vector<16x128xf32>
    %16 = arith.addf %14, %15 : vector<16x128xf32>
    %cst_6 = arith.constant 1.000000e+00 : f32
    %17 = vector.broadcast %cst_6 : f32 to vector<16x128xf32>
    %18 = arith.subf %17, %6 : vector<16x128xf32>
    %19 = arith.mulf %18, %5 : vector<16x128xf32>
    %20 = arith.addf %19, %16 : vector<16x128xf32>
    %cst_7 = arith.constant 1.000000e+00 : f32
    %21 = vector.broadcast %cst_7 : f32 to vector<16x128xf32>
    %22 = arith.addf %21, %10 : vector<16x128xf32>
    %cst_8 = arith.constant 1.000000e+00 : f32
    %23 = vector.broadcast %cst_8 : f32 to vector<16x128xf32>
    %24 = arith.divf %23, %22 : vector<16x128xf32>
    %25 = arith.mulf %10, %24 : vector<16x128xf32>
    %cst_9 = arith.constant 0.000000e+00 : f32
    %26 = vector.broadcast %cst_9 : f32 to vector<16x128xf32>
    %27 = arith.cmpf oge, %5, %26 : vector<16x128xf32>
    %cst_10 = arith.constant 1.000000e+00 : f32
    %28 = vector.broadcast %cst_10 : f32 to vector<16x128xf32>
    %29 = arith.subf %28, %6 : vector<16x128xf32>
    %30 = arith.select %27, %6, %29 : vector<16x128xi1>, vector<16x128xf32>
    %31 = arith.mulf %30, %25 : vector<16x128xf32>
    %cst_11 = arith.constant 1.000000e+00 : f32
    %32 = vector.broadcast %cst_11 : f32 to vector<16x128xf32>
    %33 = arith.subf %32, %30 : vector<16x128xf32>
    %34 = arith.mulf %33, %24 : vector<16x128xf32>
    %35 = arith.addf %31, %34 : vector<16x128xf32>
    %36 = arith.mulf %35, %35 : vector<16x128xf32>
    %37 = arith.mulf %36, %20 : vector<16x128xf32>
    %c1_i32_12 = arith.constant 1 : i32
    %38 = arith.addi %4, %c1_i32_12 : i32
    %c16_i32 = arith.constant 16 : i32
    %39 = arith.muli %38, %c16_i32 : i32
    %c16_i32_13 = arith.constant 16 : i32
    %40 = arith.cmpi sgt, %39, %c16_i32_13 : i32
    %true = arith.constant true
    %41 = arith.xori %40, %true : i1
    %42 = arith.extui %41 : i1 to i32
    %c0_i32_14 = arith.constant 0 : i32
    %43 = arith.cmpi ne, %42, %c0_i32_14 : i32
    scf.if %43 {
      %c0_16 = arith.constant 0 : index
      %c0_17 = arith.constant 0 : index
      %c0_18 = arith.constant 0 : index
      %46 = vector.load %arg4[%c0_16, %c0_17, %c0_18] : memref<1x8x128xf32, #tpu.memory_space<vmem>>, vector<1x8x128xf32>
      %47 = vector.shape_cast %46 : vector<1x8x128xf32> to vector<8x128xf32>
      %48 = vector.shape_cast %37 : vector<16x128xf32> to vector<1x16x128xf32>
      %cst_19 = arith.constant dense<0.000000e+00> : vector<16x128xf32>
      %49 = vector.multi_reduction <add>, %48, %cst_19 [0] : vector<1x16x128xf32> to vector<16x128xf32>
      %50 = vector.shape_cast %49 : vector<16x128xf32> to vector<2x8x128xf32>
      %cst_20 = arith.constant dense<0.000000e+00> : vector<8x128xf32>
      %51 = vector.multi_reduction <add>, %50, %cst_20 [0] : vector<2x8x128xf32> to vector<8x128xf32>
      %52 = arith.addf %47, %51 : vector<8x128xf32>
      %c0_21 = arith.constant 0 : index
      %c0_22 = arith.constant 0 : index
      %c0_23 = arith.constant 0 : index
      %53 = vector.load %arg4[%c0_21, %c0_22, %c0_23] : memref<1x8x128xf32, #tpu.memory_space<vmem>>, vector<1x8x128xf32>
      %54 = vector.shape_cast %53 : vector<1x8x128xf32> to vector<8x128xf32>
      %55 = vector.shape_cast %52 : vector<8x128xf32> to vector<1x8x128xf32>
      tpu.vector_store %arg4[%c0_21, %c0_22, %c0_23], %55 {strides = array<i32>} : memref<1x8x128xf32, #tpu.memory_space<vmem>>, vector<1x8x128xf32>,
    } else {
    }
    %44 = arith.extui %40 : i1 to i32
    %c0_i32_15 = arith.constant 0 : i32
    %45 = arith.cmpi ne, %44, %c0_i32_15 : i32
    scf.if %45 {
      %46 = tpu.iota {dimensions = array<i32: 0>} : vector<16x128xi32>
      %c16_i32_16 = arith.constant 16 : i32
      %47 = arith.muli %4, %c16_i32_16 : i32
      %48 = vector.broadcast %47 : i32 to vector<16x128xi32>
      %49 = arith.addi %48, %46 : vector<16x128xi32>
      %c16_i32_17 = arith.constant 16 : i32
      %50 = vector.broadcast %c16_i32_17 : i32 to vector<16x128xi32>
      %51 = arith.cmpi slt, %49, %50 : vector<16x128xi32>
      %c0_18 = arith.constant 0 : index
      %c0_19 = arith.constant 0 : index
      %c0_20 = arith.constant 0 : index
      %52 = vector.load %arg4[%c0_18, %c0_19, %c0_20] : memref<1x8x128xf32, #tpu.memory_space<vmem>>, vector<1x8x128xf32>
      %53 = vector.shape_cast %52 : vector<1x8x128xf32> to vector<8x128xf32>
      %cst_21 = arith.constant 0.000000e+00 : f32
      %54 = vector.broadcast %cst_21 : f32 to vector<16x128xf32>
      %55 = arith.select %51, %37, %54 : vector<16x128xi1>, vector<16x128xf32>
      %56 = vector.shape_cast %55 : vector<16x128xf32> to vector<1x16x128xf32>
      %cst_22 = arith.constant dense<0.000000e+00> : vector<16x128xf32>
      %57 = vector.multi_reduction <add>, %56, %cst_22 [0] : vector<1x16x128xf32> to vector<16x128xf32>
      %58 = vector.shape_cast %57 : vector<16x128xf32> to vector<2x8x128xf32>
      %cst_23 = arith.constant dense<0.000000e+00> : vector<8x128xf32>
      %59 = vector.multi_reduction <add>, %58, %cst_23 [0] : vector<2x8x128xf32> to vector<8x128xf32>
      %60 = arith.addf %53, %59 : vector<8x128xf32>
      %c0_24 = arith.constant 0 : index
      %c0_25 = arith.constant 0 : index
      %c0_26 = arith.constant 0 : index
      %61 = vector.load %arg4[%c0_24, %c0_25, %c0_26] : memref<1x8x128xf32, #tpu.memory_space<vmem>>, vector<1x8x128xf32>
      %62 = vector.shape_cast %61 : vector<1x8x128xf32> to vector<8x128xf32>
      %63 = vector.shape_cast %60 : vector<8x128xf32> to vector<1x8x128xf32>
      tpu.vector_store %arg4[%c0_24, %c0_25, %c0_26], %63 {strides = array<i32>} : memref<1x8x128xf32, #tpu.memory_space<vmem>>, vector<1x8x128xf32>,
    } else {
    }
    return
  }
  func.func @transform_0(%arg0: i32, %arg1: i32) -> (i32, i32) {
    %c1_i32 = arith.constant 1 : i32
    %0 = arith.muli %arg0, %c1_i32 : i32
    %1 = arith.addi %0, %arg1 : i32
    %c0_i32 = arith.constant 0 : i32
    %c0_i32_0 = arith.constant 0 : i32
    return %1, %c0_i32 : i32, i32
  }
  func.func @transform_1(%arg0: i32, %arg1: i32) -> (i32, i32) {
    %c1_i32 = arith.constant 1 : i32
    %0 = arith.muli %arg0, %c1_i32 : i32
    %1 = arith.addi %0, %arg1 : i32
    %c0_i32 = arith.constant 0 : i32
    %c0_i32_0 = arith.constant 0 : i32
    return %1, %c0_i32 : i32, i32
  }
  func.func @transform_2(%arg0: i32, %arg1: i32) -> (i32, i32, i32) {
    %c0_i32 = arith.constant 0 : i32
    %c0_i32_0 = arith.constant 0 : i32
    %c0_i32_1 = arith.constant 0 : i32
    return %arg0, %c0_i32, %c0_i32_0 : i32, i32, i32
  }
}

</mosaic_0001>

<bundles_post_ra>
// kernel: tpu_custom_call.1
= control target key start
LH: loop header
LB: loop body
LE: loop exit
PB: predicated region body
PF: predicated region fallthrough
CT: control target
= control target key end

     0   :  { %7 = vsyncpa [#allocation3], 0  ;;  %s292_s0 = inlined_call_operand.hbm [shape: f32[16,128], index: 0, kind: input, shape index: {}]   ;;  %s293_s1 = inlined_call_operand.hbm [shape: f32[16,128], index: 1, kind: input, shape index: {}]   ;;  %s294_s2 = inlined_call_operand.hbm [shape: f32[1,8,128], index: 2, kind: output, shape index: {}]  }
   0x1   :  { %8 = vsyncpa [#allocation6], 0 }
   0x2   :  { %9 = vsyncpa [#allocation4], 0  ;;  %s257_s9 = smov [#allocation2]  }
   0x3   :  { %s19_s10 = sshll.u32 %s257_s9, 4  ;;  %s20_s10 = int_to_ptr.vmem [resolvable:$true] %s19_s10 }
   0x4   :  { %s199_s11 = scalar_lea.vmem %s20_s10, 256  ;;  %p204_p1 = scmp.lt.s32.totalorder %s20_s10, %s20_s10 }
   0x5   :  { %p200_p0 = scmp.ne.s32.totalorder %s20_s10, %s199_s11  ;;  %p205_p2 = scmp.lt.s32.totalorder %s199_s11, %s199_s11 }
   0x7   :  { %p206_p3 = por %p205_p2, %p204_p1 }
   0x9   :  { %p207_p4 = pnand %p206_p3, %p200_p0 }
   0xb   :  { %210 = shalt.err (!%p207_p4)
}
   0xc   :  { %s258_s12 = smov 128   ;;  %s259_s13 = smov 8  }
   0xd   :  { %25 = dma.hbm_to_vmem [thread:$0]  %s292_s0, 256, %s20_s10, [#allocation3], %s258_s12, %s258_s12, %s259_s13  }
   0xe   :  { %s260_s16 = smov [#allocation5]  }
   0xf   :  { %s35_s17 = sshll.u32 %s260_s16, 4  ;;  %s36_s17 = int_to_ptr.vmem [resolvable:$true] %s35_s17 }
  0x10   :  { %s219_s18 = scalar_lea.vmem %s36_s17, 256  ;;  %p224_p6 = scmp.lt.s32.totalorder %s36_s17, %s36_s17 }
  0x11   :  { %p220_p5 = scmp.ne.s32.totalorder %s36_s17, %s219_s18  ;;  %p225_p7 = scmp.lt.s32.totalorder %s219_s18, %s219_s18 }
  0x13   :  { %p226_p8 = por %p225_p7, %p224_p6 }
  0x15   :  { %p227_p9 = pnand %p226_p8, %p220_p5 }
  0x17   :  { %230 = shalt.err (!%p227_p9)
}
  0x18   :  { %41 = dma.hbm_to_vmem [thread:$0]  %s293_s1, 256, %s36_s17, [#allocation6], %s258_s12, %s258_s12, %s259_s13  }
  0x19   :  { %251 = dma.done.wait [#allocation3], 256  }
  0x1a   :  { %252 = vsyncadd [#allocation3], 4294967040 }
  0x1b   :  { %253 = dma.done.wait [#allocation6], 256  }
  0x1c   :  { %254 = vsyncadd [#allocation6], 4294967040  ;;  %v58_v0 = vld [vmem:[#allocation2] sm:$0xff]  ;;  %v59_v1 = vld [vmem:[#allocation2 + $0x8] sm:$0xff]  ;;  %s261_s0 = smov [#allocation7]  }
  0x1d   :  { %v62_v2 = vand.u32 2147483647, %v58_v0  ;;  %v63_v3 = vand.u32 2147483647, %v59_v1  ;;  %v60_v12 = vld [vmem:[#allocation5] sm:$0xff]  ;;  %v61_v13 = vld [vmem:[#allocation5 + $0x8] sm:$0xff] }
  0x1e   :  { %v94_v16 = vsub.f32 1.0, %v60_v12  ;;  %v95_v17 = vsub.f32 1.0, %v61_v13  ;;  %vm108_vm0 = vcmp.ge.f32.partialorder %v58_v0, 0.0  ;;  %vm109_vm1 = vcmp.ge.f32.partialorder %v59_v1, 0.0  ;;  %s163_s1 = sshll.u32 %s261_s0, 4  ;;  %s164_s1 = int_to_ptr.vmem [resolvable:$true] %s163_s1 }
  0x1f   :  { %v64_v4 = vsub.f32 0.0, %v62_v2  ;;  %v65_v5 = vsub.f32 0.0, %v63_v3  ;;  %v70_v19 = vsub.f32 0.0, %v58_v0  ;;  %v71_v23 = vsub.f32 0.0, %v59_v1  ;;  %s231_s21 = scalar_lea.vmem %s164_s1, 128  ;;  %p236_p11 = scmp.lt.s32.totalorder %s164_s1, %s164_s1 }
  0x20   :  { %v110_v22 = vsel %vm108_vm0, %v60_v12, %v94_v16  ;;  %v111_v25 = vsel %vm109_vm1, %v61_v13, %v95_v17  ;;  %v96_v38 = vmul.f32 %v94_v16, %v58_v0  ;;  %v97_v41 = vmul.f32 %v95_v17, %v59_v1  ;;  %p232_p10 = scmp.ne.s32.totalorder %s164_s1, %s231_s21  ;;  %p237_p12 = scmp.lt.s32.totalorder %s231_s21, %s231_s21 }
  0x21   :  { %v66_v6 = vmul.f32 1.442695, %v64_v4  ;;  %v68_v7 = vmul.f32 1.442695, %v65_v5  ;;  %v114_v27 = vsub.f32 1.0, %v110_v22  ;;  %v72_v29 = vmax.f32 %v70_v19, 0.0 }
  0x22   :  { %v115_v32 = vsub.f32 1.0, %v111_v25  ;;  %v73_v34 = vmax.f32 %v71_v23, 0.0  ;;  %p238_p13 = por %p237_p12, %p236_p11 }
  0x23   :  { %179 = vpow2.f32 %v66_v6 }
  0x24   :  { %181 = vpow2.f32 %v68_v7  ;;  %p239_p0 = pnand %p238_p13, %p232_p10 }
  0x30   :  { %v180_v8 = vpop.eup %179 }
  0x31   :  { %v182_v9 = vpop.eup %181  ;;  %v74_v10 = vadd.f32 1.0, %v180_v8  ;;  %v77_v14 = vmul.f32 -0.5, %v180_v8  ;;  %v80_v20 = vand.u32 2147483647, %v180_v8 }
  0x32   :  { %v83_v11 = vadd.f32 1.0, %v182_v9  ;;  %v86_v15 = vmul.f32 -0.5, %v182_v9  ;;  %v89_v24 = vand.u32 2147483647, %v182_v9 }
  0x33   :  { %183 = vlog2.f32 %v74_v10  ;;  %v78_v18 = vadd.f32 1.0, %v77_v14  ;;  %vm283_vm2 = vcmp.lt.f32.partialorder %v80_v20, 0.0004427343 }
  0x34   :  { %185 = vlog2.f32 %v83_v11  ;;  %v87_v21 = vadd.f32 1.0, %v86_v15  ;;  %vm90_vm3 = vcmp.lt.f32.partialorder %v89_v24, 0.0004427343 }
  0x35   :  { %187 = vrcp.f32 %v74_v10  ;;  %v79_v26 = vmul.f32 %v180_v8, %v78_v18 }
  0x36   :  { %189 = vrcp.f32 %v83_v11  ;;  %v88_v31 = vmul.f32 %v182_v9, %v87_v21 }
  0x40   :  { %v184_v28 = vpop.eup %183 }
  0x41   :  { %v186_v33 = vpop.eup %185  ;;  %v76_v35 = vmul.f32 0.6931472, %v184_v28 }
  0x42   :  { %v188_v36 = vpop.eup %187  ;;  %v85_v37 = vmul.f32 0.6931472, %v186_v33 }
  0x43   :  { %v190_v39 = vpop.eup %189  ;;  %v82_v40 = vsel %vm283_vm2, %v79_v26, %v76_v35  ;;  %v106_v42 = vmul.f32 %v188_v36, %v180_v8  ;;  %v116_v43 = vmul.f32 %v188_v36, %v114_v27 }
  0x44   :  { %v91_v44 = vsel %vm90_vm3, %v88_v31, %v85_v37  ;;  %v92_v45 = vadd.f32 %v82_v40, %v72_v29  ;;  %v107_v46 = vmul.f32 %v190_v39, %v182_v9  ;;  %v117_v47 = vmul.f32 %v190_v39, %v115_v32 }
  0x45   :  { %v93_v48 = vadd.f32 %v91_v44, %v73_v34  ;;  %v112_v49 = vmul.f32 %v110_v22, %v106_v42 }
  0x46   :  { %v113_v50 = vmul.f32 %v111_v25, %v107_v46  ;;  %v98_v51 = vadd.f32 %v96_v38, %v92_v45 }
  0x47   :  { %v118_v52 = vadd.f32 %v116_v43, %v112_v49  ;;  %v99_v53 = vadd.f32 %v97_v41, %v93_v48 }
  0x48   :  { %v119_v54 = vadd.f32 %v117_v47, %v113_v50 }
  0x49   :  { %v120_v55 = vmul.f32 %v118_v52, %v118_v52 }
  0x4a   :  { %v121_v56 = vmul.f32 %v119_v54, %v119_v54 }
  0x4b   :  { %v122_v57 = vmul.f32 %v120_v55, %v98_v51 }
  0x4c   :  { %v123_v58 = vmul.f32 %v121_v56, %v99_v53 }
  0x4e   :  { %v134_v59 = vadd.f32 %v123_v58, %v122_v57 }
  0x50   :  { %136 = vst [vmem:[#allocation7] sm:$0xff] %v134_v59 }
  0x51   :  { %242 = shalt.err (!%p239_p0)
}
  0x52   :  { %166 = dma.vmem_to_hbm [thread:$0]  %s164_s1, 128, %s294_s2, [#allocation4]  }
  0x53   :  { %255 = dma.done.wait [#allocation4], 128  }
  0x54   :  { %256 = vsyncadd [#allocation4], 4294967168 }
  0x55   :  { %170 = vsyncpa [#allocation3], 1 }
  0x56   :  { %171 = vsyncpa [#allocation6], 1 }
  0x57   :  { %172 = vsyncpa [#allocation4], 1 }

</bundles_post_ra>
